<compile_context>
chip_gen: v5e
topology: v5e:2x2
jax: 0.10.0
libtpu: 0.0.40
codegen_flags: <defaults>
</compile_context>

<pallas_src>
import functools

import jax
import jax.numpy as jnp
from jax.experimental import pallas as pl
from jax.experimental.pallas import tpu as pltpu

LANE = 128     # vreg lane width; all feature dims are padded to this
HIDDEN = 64    # fc1/fc2 output width (from the PyTorch module)


def _round_up(n, m):
    return ((n + m - 1) // m) * m


def _mlp_kernel(x_ref, w_ref, b_ref, o_ref):
    # x_ref: (TB, 128)      bf16  -- state features zero-padded to 128 lanes
    # w_ref: (3, 128, 128)  bf16  -- [w1; w2; w3] zero-padded, (in, out) layout
    # b_ref: (3, 128)       f32   -- [b1; b2; b3] zero-padded
    # o_ref: (TB, 128)      f32   -- first espacoAcao lanes are the real outputs
    x = x_ref[...]

    # fc1 + ReLU: bf16 MXU matmul with f32 accumulate; bias/ReLU in f32 (VPU)
    h = jnp.dot(x, w_ref[0], preferred_element_type=jnp.float32) + b_ref[0:1, :]
    h = jnp.maximum(h, 0.0).astype(jnp.bfloat16)

    # fc2 + ReLU
    h = jnp.dot(h, w_ref[1], preferred_element_type=jnp.float32) + b_ref[1:2, :]
    h = jnp.maximum(h, 0.0).astype(jnp.bfloat16)

    # fc3 (no activation): lane-dense 128-wide f32 store
    o_ref[...] = jnp.dot(h, w_ref[2], preferred_element_type=jnp.float32) + b_ref[2:3, :]


def pack_params(params):
    """Pads + packs the three linear layers for the kernel.

    Weights are stored (in_dim, out_dim) -- transposed relative to torch's
    nn.Linear.weight -- so each layer computes y = x @ W + b, matching
    nn.Linear.  Everything is zero-padded to 128 lanes (exact padding).
    Call once per weight update and reuse the packed arrays.
    """
    def pad_w(w):
        w = jnp.asarray(w, jnp.float32)
        i, o = w.shape
        assert i <= LANE and o <= LANE, "single-tile kernel: dims must be <= 128"
        return jnp.zeros((LANE, LANE), jnp.float32).at[:i, :o].set(w)

    def pad_b(b):
        b = jnp.asarray(b, jnp.float32).reshape(-1)
        return jnp.zeros((LANE,), jnp.float32).at[: b.shape[0]].set(b)

    w_all = jnp.stack([pad_w(params["w1"]), pad_w(params["w2"]), pad_w(params["w3"])])
    b_all = jnp.stack([pad_b(params["b1"]), pad_b(params["b2"]), pad_b(params["b3"])])
    return w_all.astype(jnp.bfloat16), b_all  # bf16 MXU operands, f32 biases


@functools.partial(jax.jit, static_argnames=("espaco_acao", "tile_b"))
def rede_neural_forward(x, w_all, b_all, *, espaco_acao, tile_b=256):
    """Full 3-layer MLP forward.

    x: (B, estado) float32;  w_all/b_all: output of pack_params.
    Returns (B, espaco_acao) float32.
    """
    B, estado = x.shape
    assert estado <= LANE and espaco_acao <= LANE  # Lunar Lander: 8 / 4

    # Batch tile: at least one (8,128) sublane group, at most tile_b rows.
    TB = min(tile_b, _round_up(B, 8))
    B_pad = _round_up(B, TB)

    # Lane-pad features to 128 and cast the MXU LHS operand to bf16.
    x_pad = jnp.pad(x.astype(jnp.bfloat16), ((0, B_pad - B), (0, LANE - estado)))

    out = pl.pallas_call(
        _mlp_kernel,
        out_shape=jax.ShapeDtypeStruct((B_pad, LANE), jnp.float32),
        grid_spec=pltpu.PrefetchScalarGridSpec(
            num_scalar_prefetch=0,
            grid=(B_pad // TB,),
            in_specs=[
                pl.BlockSpec((TB, LANE), lambda i: (i, 0)),          # x tile (pipelined)
                pl.BlockSpec((3, LANE, LANE), lambda i: (0, 0, 0)),  # weights, VMEM-resident
                pl.BlockSpec((3, LANE), lambda i: (0, 0)),           # biases, VMEM-resident
            ],
            out_specs=pl.BlockSpec((TB, LANE), lambda i: (i, 0)),    # lane-dense output
        ),
        compiler_params=pltpu.CompilerParams(
            dimension_semantics=("parallel",),  # shard batch tiles across TCs on v7x
        ),
    )(x_pad, w_all, b_all)

    return out[:B, :espaco_acao]


def init_params(key, estado, espaco_acao):
    """Deterministic init mimicking nn.Linear default (uniform(+-1/sqrt(fan_in)))."""
    keys = jax.random.split(key, 6)

    def linear(kw, kb, fan_in, fan_out):
        bound = 1.0 / jnp.sqrt(jnp.float32(fan_in))
        w = jax.random.uniform(kw, (fan_in, fan_out), jnp.float32, -bound, bound)
        b = jax.random.uniform(kb, (1, fan_out), jnp.float32, -bound, bound)
        return w, b

    w1, b1 = linear(keys[0], keys[1], estado, HIDDEN)
    w2, b2 = linear(keys[2], keys[3], HIDDEN, HIDDEN)
    w3, b3 = linear(keys[4], keys[5], HIDDEN, espaco_acao)
    return {"w1": w1, "b1": b1, "w2": w2, "b2": b2, "w3": w3, "b3": b3}


def _reference_forward(x, p):
    """Pure-JAX reference mirroring the kernel's mixed precision (bf16 MXU
    operands, f32 accumulation, f32 bias/ReLU)."""
    def dot(a, w):
        return jnp.dot(a.astype(jnp.bfloat16), w.astype(jnp.bfloat16),
                       preferred_element_type=jnp.float32)

    h1 = jnp.maximum(dot(x, p["w1"]) + p["b1"], 0.0)
    h2 = jnp.maximum(dot(h1, p["w2"]) + p["b2"], 0.0)
    return dot(h2, p["w3"]) + p["b3"]


if __name__ == "__main__":
    estado = 8        # Lunar Lander observation dim
    espaco_acao = 4   # Lunar Lander action count

    key = jax.random.PRNGKey(0)
    k_params, k_x1, k_x2 = jax.random.split(key, 3)
    params = init_params(k_params, estado, espaco_acao)
    w_all, b_all = pack_params(params)  # pack/cast once, reuse across calls

    # Small batch (single tile)
    x = jax.random.normal(k_x1, (8, estado), jnp.float32)
    out = jax.block_until_ready(
        rede_neural_forward(x, w_all, b_all, espaco_acao=espaco_acao))
    ref = _reference_forward(x, params)
    assert out.shape == (8, espaco_acao)
    assert jnp.allclose(out, ref, atol=1e-3, rtol=1e-3), \
        float(jnp.max(jnp.abs(out - ref)))

    # Larger batch exercising the pipelined multi-tile path + padding slice
    x_big = jax.random.normal(k_x2, (300, estado), jnp.float32)
    out_big = jax.block_until_ready(
        rede_neural_forward(x_big, w_all, b_all, espaco_acao=espaco_acao))
    ref_big = _reference_forward(x_big, params)
    assert out_big.shape == (300, espaco_acao)
    assert jnp.allclose(out_big, ref_big, atol=1e-3, rtol=1e-3), \
        float(jnp.max(jnp.abs(out_big - ref_big)))

    print("KERNEL_OK")
</pallas_src>

<mosaic_0001>
module attributes {stable_mosaic.version = 11 : i64} {
  func.func @_mlp_kernel(%arg0: i32, %arg1: memref<8x128xbf16, #tpu.memory_space<vmem>>, %arg2: memref<3x128x128xbf16, #tpu.memory_space<vmem>>, %arg3: memref<3x128xf32, #tpu.memory_space<vmem>>, %arg4: memref<8x128xf32, #tpu.memory_space<vmem>>) attributes {dimension_semantics = [#tpu.dimension_semantics<parallel>], iteration_bounds = array<i64: 1>, scalar_prefetch = 0 : i64, scratch_operands = 0 : i64, tpu.core_type = #tpu.core_type<tc>, window_params = [{transform_indices = @transform_0, window_bounds = array<i64: 8, 128>}, {pipeline_mode = #tpu.pipeline_mode<synchronous>, transform_indices = @transform_1, window_bounds = array<i64: 3, 128, 128>}, {pipeline_mode = #tpu.pipeline_mode<synchronous>, transform_indices = @transform_2, window_bounds = array<i64: 3, 128>}, {transform_indices = @transform_3, window_bounds = array<i64: 8, 128>}]} {
    %c0 = arith.constant 0 : index
    %c0_0 = arith.constant 0 : index
    %0 = vector.load %arg1[%c0, %c0_0] : memref<8x128xbf16, #tpu.memory_space<vmem>>, vector<8x128xbf16>
    %c0_1 = arith.constant 0 : index
    %c0_2 = arith.constant 0 : index
    %c0_3 = arith.constant 0 : index
    %1 = vector.load %arg2[%c0_1, %c0_2, %c0_3] : memref<3x128x128xbf16, #tpu.memory_space<vmem>>, vector<1x128x128xbf16>
    %2 = vector.shape_cast %1 : vector<1x128x128xbf16> to vector<128x128xbf16>
    %cst = arith.constant dense<0.000000e+00> : vector<8x128xf32>
    %3 = tpu.matmul %0, %2, %cst {dimension_numbers = #tpu.dot_dimension_numbers<[1], [0], [0], [1], [0, 0, 1, 1], [], []>} : vector<8x128xbf16>, vector<128x128xbf16>, vector<8x128xf32> -> vector<8x128xf32>
    %c0_4 = arith.constant 0 : index
    %c0_5 = arith.constant 0 : index
    %4 = vector.load %arg3[%c0_4, %c0_5] : memref<3x128xf32, #tpu.memory_space<vmem>>, vector<1x128xf32>
    %5 = vector.broadcast %4 : vector<1x128xf32> to vector<8x128xf32>
    %6 = arith.addf %3, %5 : vector<8x128xf32>
    %cst_6 = arith.constant 0.000000e+00 : f32
    %7 = vector.broadcast %cst_6 : f32 to vector<8x128xf32>
    %8 = arith.maximumf %6, %7 : vector<8x128xf32>
    %9 = arith.truncf %8 : vector<8x128xf32> to vector<8x128xbf16>
    %c1 = arith.constant 1 : index
    %c0_7 = arith.constant 0 : index
    %c0_8 = arith.constant 0 : index
    %10 = vector.load %arg2[%c1, %c0_7, %c0_8] : memref<3x128x128xbf16, #tpu.memory_space<vmem>>, vector<1x128x128xbf16>
    %11 = vector.shape_cast %10 : vector<1x128x128xbf16> to vector<128x128xbf16>
    %cst_9 = arith.constant dense<0.000000e+00> : vector<8x128xf32>
    %12 = tpu.matmul %9, %11, %cst_9 {dimension_numbers = #tpu.dot_dimension_numbers<[1], [0], [0], [1], [0, 0, 1, 1], [], []>} : vector<8x128xbf16>, vector<128x128xbf16>, vector<8x128xf32> -> vector<8x128xf32>
    %c1_10 = arith.constant 1 : index
    %c0_11 = arith.constant 0 : index
    %13 = vector.load %arg3[%c1_10, %c0_11] : memref<3x128xf32, #tpu.memory_space<vmem>>, vector<1x128xf32>
    %14 = vector.broadcast %13 : vector<1x128xf32> to vector<8x128xf32>
    %15 = arith.addf %12, %14 : vector<8x128xf32>
    %cst_12 = arith.constant 0.000000e+00 : f32
    %16 = vector.broadcast %cst_12 : f32 to vector<8x128xf32>
    %17 = arith.maximumf %15, %16 : vector<8x128xf32>
    %18 = arith.truncf %17 : vector<8x128xf32> to vector<8x128xbf16>
    %c2 = arith.constant 2 : index
    %c0_13 = arith.constant 0 : index
    %c0_14 = arith.constant 0 : index
    %19 = vector.load %arg2[%c2, %c0_13, %c0_14] : memref<3x128x128xbf16, #tpu.memory_space<vmem>>, vector<1x128x128xbf16>
    %20 = vector.shape_cast %19 : vector<1x128x128xbf16> to vector<128x128xbf16>
    %cst_15 = arith.constant dense<0.000000e+00> : vector<8x128xf32>
    %21 = tpu.matmul %18, %20, %cst_15 {dimension_numbers = #tpu.dot_dimension_numbers<[1], [0], [0], [1], [0, 0, 1, 1], [], []>} : vector<8x128xbf16>, vector<128x128xbf16>, vector<8x128xf32> -> vector<8x128xf32>
    %c2_16 = arith.constant 2 : index
    %c0_17 = arith.constant 0 : index
    %22 = vector.load %arg3[%c2_16, %c0_17] : memref<3x128xf32, #tpu.memory_space<vmem>>, vector<1x128xf32>
    %23 = vector.broadcast %22 : vector<1x128xf32> to vector<8x128xf32>
    %24 = arith.addf %21, %23 : vector<8x128xf32>
    %c0_18 = arith.constant 0 : index
    %c0_19 = arith.constant 0 : index
    %25 = vector.load %arg4[%c0_18, %c0_19] : memref<8x128xf32, #tpu.memory_space<vmem>>, vector<8x128xf32>
    tpu.vector_store %arg4[%c0_18, %c0_19], %24 {strides = array<i32>} : memref<8x128xf32, #tpu.memory_space<vmem>>, vector<8x128xf32>,
    return
  }
  func.func @transform_0(%arg0: i32) -> (i32, i32) {
    %c0_i32 = arith.constant 0 : i32
    %c0_i32_0 = arith.constant 0 : i32
    return %arg0, %c0_i32 : i32, i32
  }
  func.func @transform_1(%arg0: i32) -> (i32, i32, i32) {
    %c0_i32 = arith.constant 0 : i32
    %c0_i32_0 = arith.constant 0 : i32
    %c0_i32_1 = arith.constant 0 : i32
    %c0_i32_2 = arith.constant 0 : i32
    return %c0_i32, %c0_i32_0, %c0_i32_1 : i32, i32, i32
  }
  func.func @transform_2(%arg0: i32) -> (i32, i32) {
    %c0_i32 = arith.constant 0 : i32
    %c0_i32_0 = arith.constant 0 : i32
    %c0_i32_1 = arith.constant 0 : i32
    return %c0_i32, %c0_i32_0 : i32, i32
  }
  func.func @transform_3(%arg0: i32) -> (i32, i32) {
    %c0_i32 = arith.constant 0 : i32
    %c0_i32_0 = arith.constant 0 : i32
    return %arg0, %c0_i32 : i32, i32
  }
}

</mosaic_0001>

<bundles_post_ra>
// kernel: rede_neural_forward.1
= control target key start
LH: loop header
LB: loop body
LE: loop exit
PB: predicated region body
PF: predicated region fallthrough
CT: control target
= control target key end

     0   :  { %8 = vsyncpa [#allocation3], 0  ;;  %s432_s15 = smov [#allocation2]   ;;  %s433_s17 = smov 64   ;;  %s473_s0 = inlined_call_operand.vmem [shape: bf16[8,128], index: 0, kind: input, shape index: {}]   ;;  %s474_s1 = inlined_call_operand.hbm [shape: bf16[3,128,128], index: 1, kind: input, shape index: {}]   ;;  %s475_s2 = inlined_call_operand.vmem [shape: f32[3,128], index: 2, kind: input, shape index: {}]   ;;  %s476_s3 = inlined_call_operand.vmem [shape: f32[8,128], index: 3, kind: output, shape index: {}]  }
   0x1   :  { %s15_s14 = sshll.u32 %s474_s1, 4  ;;  %s17_s16 = sshll.u32 %s432_s15, 4  ;;  %s16_s14 = int_to_ptr.hbm [resolvable:$true] %s15_s14  ;;  %s18_s16 = int_to_ptr.vmem [resolvable:$true] %s17_s16 }
   0x2   :  { %s434_s18 = smov 4  }
   0x3   :  { %23 = dma.hbm_to_vmem [thread:$0]  %s16_s14, 3072, %s18_s16, [#allocation3], %s433_s17, %s433_s17, %s434_s18  }
   0x4   :  { %430 = dma.done.wait [#allocation3], 3072  }
   0x5   :  { %431 = vsyncadd [#allocation3], 4294964224  ;;  %v383_v0 = vld [vmem:[#allocation2 + $0x38] sm:$0xff]  ;;  %v382_v1 = vld [vmem:[#allocation2 + $0x30] sm:$0xff] }
   0x6   :  { %97 = vmatpush.bf16.msra.mxu0 %v383_v0  ;;  %v391_v2 = vld [vmem:[#allocation2 + $0x78] sm:$0xff]  ;;  %v390_v3 = vld [vmem:[#allocation2 + $0x70] sm:$0xff]  ;;  %v381_v4 = vld [vmem:[#allocation2 + $0x28] sm:$0xff] }
   0x7   :  { %179 = vmatpush.bf16.msra.mxu1 %v391_v2  ;;  %v389_v5 = vld [vmem:[#allocation2 + $0x68] sm:$0xff]  ;;  %v380_v6 = vld [vmem:[#allocation2 + $0x20] sm:$0xff]  ;;  %v379_v8 = vld [vmem:[#allocation2 + $0x18] sm:$0xff] }
   0x8   :  { %v388_v7 = vld [vmem:[#allocation2 + $0x60] sm:$0xff]  ;;  %v387_v9 = vld [vmem:[#allocation2 + $0x58] sm:$0xff]  ;;  %v378_v10 = vld [vmem:[#allocation2 + $0x10] sm:$0xff] }
   0x9   :  { %v386_v11 = vld [vmem:[#allocation2 + $0x50] sm:$0xff]  ;;  %v377_v12 = vld [vmem:[#allocation2 + $0x8] sm:$0xff]  ;;  %v376_v13 = vld [vmem:[#allocation2] sm:$0xff] }
   0xa   :  { %98 = vmatpush.bf16.msra.mxu0 %v382_v1  ;;  %v30_v14 = vld [vmem:[%s473_s0] sm:$0xf]  ;;  %v385_v15 = vld [vmem:[#allocation2 + $0x48] sm:$0xff]  ;;  %v399_v17 = vld [vmem:[#allocation2 + $0xb8] sm:$0xff] }
   0xb   :  { %180 = vmatpush.bf16.msra.mxu1 %v390_v3  ;;  %v384_v16 = vld [vmem:[#allocation2 + $0x40] sm:$0xff]  ;;  %261 = vmatpush.bf16.msra.mxu2 %v399_v17  ;;  %v398_v18 = vld [vmem:[#allocation2 + $0xb0] sm:$0xff]  ;;  %v397_v19 = vld [vmem:[#allocation2 + $0xa8] sm:$0xff] }
   0xc   :  { %v396_v20 = vld [vmem:[#allocation2 + $0xa0] sm:$0xff]  ;;  %v395_v21 = vld [vmem:[#allocation2 + $0x98] sm:$0xff]  ;;  %v394_v22 = vld [vmem:[#allocation2 + $0x90] sm:$0xff] }
   0xd   :  { %v403_v23 = vld [vmem:[%s475_s2] ss:$0 sm:$0xff]  ;;  %v393_v29 = vld [vmem:[#allocation2 + $0x88] sm:$0xff]  ;;  %v404_v31 = vld [vmem:[%s475_s2 + $0x1] ss:$0 sm:$0xff] }
   0xe   :  { %99 = vmatpush.bf16.msra.mxu0 %v381_v4  ;;  %v392_v30 = vld [vmem:[#allocation2 + $0x80] sm:$0xff] }
   0xf   :  { %181 = vmatpush.bf16.msra.mxu1 %v389_v5  ;;  %262 = vmatpush.bf16.msra.mxu2 %v398_v18  ;;  %v405_v37 = vld [vmem:[%s475_s2 + $0x2] ss:$0 sm:$0xff] }
  0x12   :  { %100 = vmatpush.bf16.msra.mxu0 %v380_v6 }
  0x13   :  { %182 = vmatpush.bf16.msra.mxu1 %v388_v7  ;;  %263 = vmatpush.bf16.msra.mxu2 %v397_v19 }
  0x16   :  { %101 = vmatpush.bf16.msra.mxu0 %v379_v8 }
  0x17   :  { %183 = vmatpush.bf16.msra.mxu1 %v387_v9  ;;  %264 = vmatpush.bf16.msra.mxu2 %v396_v20 }
  0x1a   :  { %102 = vmatpush.bf16.msra.mxu0 %v378_v10 }
  0x1b   :  { %184 = vmatpush.bf16.msra.mxu1 %v386_v11  ;;  %265 = vmatpush.bf16.msra.mxu2 %v395_v21 }
  0x1e   :  { %103 = vmatpush.bf16.msra.mxu0 %v377_v12 }
  0x1f   :  { %185 = vmatpush.bf16.msra.mxu1 %v385_v15  ;;  %266 = vmatpush.bf16.msra.mxu2 %v394_v22 }
  0x22   :  { %104 = vmatpush.bf16.msra.mxu0 %v376_v13 }
  0x23   :  { %186 = vmatpush.bf16.msra.mxu1 %v384_v16  ;;  %267 = vmatpush.bf16.msra.mxu2 %v393_v29 }
  0x25   :  { %105 = vmatmul.bf16.vlgmr.msra.gmra.mxu0 %v30_v14 }
  0x27   :  { %268 = vmatpush.bf16.msra.mxu2 %v392_v30 }
  0xa2   :  { %v106_v24 = vpop.f32.mrf.mxu0 }
  0xa3   :  { %v107_v25 = vadd.f32 %v403_v23, %v106_v24 }
  0xa5   :  { %v110_v26 = vmax.f32 %v107_v25, 0.0 }
  0xa7   :  { %v111_v27 = vpack.c.bf16 %v110_v26, %v110_v26 }
  0xa9   :  { %187 = vmatmul.bf16.vlgmr.msra.gmra.mxu1 %v111_v27 }
  0xaa   :  { %v108_v28 = vpop.f32.mrf.mxu0 }
 0x126   :  { %v188_v32 = vpop.f32.mrf.mxu1 }
 0x127   :  { %v189_v33 = vadd.f32 %v404_v31, %v188_v32 }
 0x129   :  { %v192_v34 = vmax.f32 %v189_v33, 0.0 }
 0x12b   :  { %v193_v35 = vpack.c.bf16 %v192_v34, %v192_v34 }
 0x12d   :  { %269 = vmatmul.bf16.vlgmr.msra.gmra.mxu2 %v193_v35 }
 0x12e   :  { %v190_v36 = vpop.f32.mrf.mxu1 }
 0x1b0   :  { %v270_v38 = vpop.f32.mrf.mxu2 }
 0x1b1   :  { %v271_v39 = vadd.f32 %v405_v37, %v270_v38 }
 0x1b3   :  { %274 = vst [vmem:[%s476_s3] sm:$0xff] %v271_v39 }
 0x1b8   :  { %v272_v40 = vpop.f32.mrf.mxu2 }
 0x1b9   :  { %279 = vsyncpa [#allocation3], 1 }

</bundles_post_ra>
